<compile_context>
chip_gen: v7x
topology: tpu7x:2x2x1
jax: 0.10.0
libtpu: 0.0.40
codegen_flags: <defaults>
</compile_context>

<pallas_src>
import jax
import jax.numpy as jnp
from jax.experimental import pallas as pl
from jax.experimental.pallas import tpu as pltpu

EPS = 1e-5
LANE = 128


def _round_up(n, m):
    return ((n + m - 1) // m) * m


# ----------------------------------------------------------------------------
# Kernel: one grid step == one slab (clean batch or corrupted batch).
# ----------------------------------------------------------------------------
def scarf_kernel(x_ref, w1_ref, w_ref, v_ref, out_ref):
    """
    x_ref  : (batch, Din_pad)  f32  zero-padded input features (one slab)
    w1_ref : (Din_pad, D)      f32  first encoder Linear (pre-BN bias cancels)
    w_ref  : (5, D, D)         f32  w2, w3, w4, w5, w6 stacked
    v_ref  : (10, D)           f32  rows: g1, be1, g2, be2, g3, be3, b4, g5, be5, b6
    out_ref: (batch, D)        f32
    """
    batch = x_ref.shape[0]
    inv_b = 1.0 / float(batch)

    v = v_ref[...]  # load the small vector block once

    def bn_relu(h, g_row, b_row):
        # Folded BatchNorm1d (training: batch mean, biased batch var) + ReLU.
        gamma = v[g_row:g_row + 1, :]
        beta = v[b_row:b_row + 1, :]
        s1 = jnp.sum(h, axis=0, keepdims=True)
        s2 = jnp.sum(h * h, axis=0, keepdims=True)
        mean = s1 * inv_b
        var = jnp.maximum(s2 * inv_b - mean * mean, 0.0)
        scale = gamma * jax.lax.rsqrt(var + EPS)      # EUP rsqrt
        shift = beta - mean * scale
        return jnp.maximum(h * scale + shift, 0.0)    # single FMA + relu

    x = x_ref[...]

    # ---- encoder: [Linear -> BN -> ReLU] x 3, then Linear (+ bias) ----
    h = jnp.dot(x, w1_ref[...], preferred_element_type=jnp.float32)
    h = bn_relu(h, 0, 1)
    h = jnp.dot(h, w_ref[0], preferred_element_type=jnp.float32)
    h = bn_relu(h, 2, 3)
    h = jnp.dot(h, w_ref[1], preferred_element_type=jnp.float32)
    h = bn_relu(h, 4, 5)
    h = jnp.dot(h, w_ref[2], preferred_element_type=jnp.float32) + v[6:7, :]

    # ---- pretraining head: Linear -> BN -> ReLU, then Linear (+ bias) ----
    h = jnp.dot(h, w_ref[3], preferred_element_type=jnp.float32)
    h = bn_relu(h, 7, 8)
    h = jnp.dot(h, w_ref[4], preferred_element_type=jnp.float32) + v[9:10, :]

    out_ref[...] = h


# ----------------------------------------------------------------------------
# Host-side packing / wrappers
# ----------------------------------------------------------------------------
def pack_params(params, input_dim, emb_dim):
    """Zero-pad to lane-dense shapes and pack into 3 operands."""
    din_pad = _round_up(input_dim, LANE)
    d = _round_up(emb_dim, LANE)

    def pad_w(w, rows, cols):
        out = jnp.zeros((rows, cols), jnp.float32)
        return out.at[: w.shape[0], : w.shape[1]].set(w)

    def pad_v(v, cols):
        flat = v.reshape(-1)
        out = jnp.zeros((cols,), jnp.float32)
        return out.at[: flat.shape[0]].set(flat)

    w1 = pad_w(params["w1"], din_pad, d)
    w_rest = jnp.stack(
        [pad_w(params[k], d, d) for k in ("w2", "w3", "w4", "w5", "w6")]
    )
    # Pre-BN biases (b1, b2, b3, b5) are mathematically cancelled by BN -> omitted.
    vecs = jnp.stack([
        pad_v(params["g1"], d), pad_v(params["be1"], d),
        pad_v(params["g2"], d), pad_v(params["be2"], d),
        pad_v(params["g3"], d), pad_v(params["be3"], d),
        pad_v(params["b4"], d),
        pad_v(params["g5"], d), pad_v(params["be5"], d),
        pad_v(params["b6"], d),
    ])
    return w1, w_rest, vecs, din_pad, d


def scarf_encode_pair(x_stacked_pad, w1, w_rest, vecs, emb_dim):
    """Run both slabs (clean, corrupted) through encoder + pretraining head."""
    n_slab, batch, din_pad = x_stacked_pad.shape
    d = w1.shape[1]
    n_w = w_rest.shape[0]
    n_v = vecs.shape[0]

    out = pl.pallas_call(
        scarf_kernel,
        out_shape=jax.ShapeDtypeStruct((n_slab, batch, d), jnp.float32),
        grid=(n_slab,),
        in_specs=[
            pl.BlockSpec((None, batch, din_pad), lambda s: (s, 0, 0)),  # per-slab x
            pl.BlockSpec((din_pad, d), lambda s: (0, 0)),               # w1 resident
            pl.BlockSpec((n_w, d, d), lambda s: (0, 0, 0)),             # w2..w6 resident
            pl.BlockSpec((n_v, d), lambda s: (0, 0)),                   # vectors resident
        ],
        out_specs=pl.BlockSpec((None, batch, d), lambda s: (s, 0, 0)),
        compiler_params=pltpu.CompilerParams(
            dimension_semantics=("parallel",),  # shard slabs across TCs on megacore
        ),
    )(x_stacked_pad, w1, w_rest, vecs)
    return out[:, :, :emb_dim]


def init_params(key, input_dim, emb_dim):
    """PyTorch-style uniform +/- 1/sqrt(fan_in) init (all biases kept in the dict)."""
    keys = jax.random.split(key, 12)

    def linear(kw, kb, fan_in, fan_out):
        bound = 1.0 / jnp.sqrt(fan_in)
        w = jax.random.uniform(kw, (fan_in, fan_out), jnp.float32, -bound, bound)
        b = jax.random.uniform(kb, (1, fan_out), jnp.float32, -bound, bound)
        return w, b

    p = {}
    p["w1"], p["b1"] = linear(keys[0], keys[1], input_dim, emb_dim)
    p["w2"], p["b2"] = linear(keys[2], keys[3], emb_dim, emb_dim)
    p["w3"], p["b3"] = linear(keys[4], keys[5], emb_dim, emb_dim)
    p["w4"], p["b4"] = linear(keys[6], keys[7], emb_dim, emb_dim)
    p["w5"], p["b5"] = linear(keys[8], keys[9], emb_dim, emb_dim)
    p["w6"], p["b6"] = linear(keys[10], keys[11], emb_dim, emb_dim)
    for name in ("1", "2", "3", "5"):
        p["g" + name] = jnp.ones((1, emb_dim), jnp.float32)
        p["be" + name] = jnp.zeros((1, emb_dim), jnp.float32)
    return p


def scarf_forward(x, params, features_low, features_high, corruption_len, key):
    """Full SCARF.forward: returns (embeddings, embeddings_corrupted, x_corrupted)."""
    batch, m = x.shape
    emb_dim = params["w4"].shape[1]
    k_perm, k_unif = jax.random.split(key)

    # Per-row random feature selection (== torch.randperm(m)[:corruption_len] per row).
    row_keys = jax.random.split(k_perm, batch)

    def row_mask(k):
        vals = jax.random.uniform(k, (m,))
        ranks = jnp.argsort(jnp.argsort(vals))
        return ranks < corruption_len

    corruption_mask = jax.vmap(row_mask)(row_keys)

    # Marginal resampling: Uniform(features_low, features_high) per feature.
    x_random = jax.random.uniform(
        k_unif, (batch, m), jnp.float32,
        minval=features_low[None, :], maxval=features_high[None, :],
    )
    x_corrupted = jnp.where(corruption_mask, x_random, x)

    # Pack params + stack both slabs into one lane-dense input.
    w1, w_rest, vecs, din_pad, _ = pack_params(params, m, emb_dim)
    x_pad = jnp.zeros((2, batch, din_pad), jnp.float32)
    x_pad = x_pad.at[0, :, :m].set(x).at[1, :, :m].set(x_corrupted)

    out = scarf_encode_pair(x_pad, w1, w_rest, vecs, emb_dim)
    return out[0], out[1], x_corrupted


# ----------------------------------------------------------------------------
# Pure-JAX reference (two-pass BN, with all biases) for a tolerance check.
# ----------------------------------------------------------------------------
def reference_forward_one(x, p):
    def bn_relu(h, g, b):
        mean = jnp.mean(h, axis=0, keepdims=True)
        var = jnp.mean((h - mean) ** 2, axis=0, keepdims=True)
        h = (h - mean) / jnp.sqrt(var + EPS) * g + b
        return jnp.maximum(h, 0.0)

    h = x @ p["w1"] + p["b1"]
    h = bn_relu(h, p["g1"], p["be1"])
    h = h @ p["w2"] + p["b2"]
    h = bn_relu(h, p["g2"], p["be2"])
    h = h @ p["w3"] + p["b3"]
    h = bn_relu(h, p["g3"], p["be3"])
    h = h @ p["w4"] + p["b4"]
    h = h @ p["w5"] + p["b5"]
    h = bn_relu(h, p["g5"], p["be5"])
    h = h @ p["w6"] + p["b6"]
    return h


if __name__ == "__main__":
    # Small shapes consistent with SCARF(input_dim, emb_dim, ...)
    batch = 8
    input_dim = 32
    emb_dim = 32
    corruption_rate = 0.6
    corruption_len = int(corruption_rate * input_dim)  # 19

    root = jax.random.PRNGKey(0)
    k_params, k_x, k_corrupt = jax.random.split(root, 3)

    params = init_params(k_params, input_dim, emb_dim)
    x = jax.random.normal(k_x, (batch, input_dim), jnp.float32)
    features_low = jnp.zeros((input_dim,), jnp.float32)
    features_high = jnp.ones((input_dim,), jnp.float32)

    emb, emb_corr, x_corrupted = scarf_forward(
        x, params, features_low, features_high, corruption_len, k_corrupt
    )
    jax.block_until_ready(emb)
    jax.block_until_ready(emb_corr)

    assert emb.shape == (batch, emb_dim)
    assert emb_corr.shape == (batch, emb_dim)

    # Numerical check vs. plain-JAX reference (one-pass variance / folded BN /
    # dropped pre-BN biases are mathematically equivalent; allow FP slack).
    ref_clean = reference_forward_one(x, params)
    ref_corr = reference_forward_one(x_corrupted, params)
    err = max(
        float(jnp.max(jnp.abs(emb - ref_clean))),
        float(jnp.max(jnp.abs(emb_corr - ref_corr))),
    )
    assert err < 2e-3, f"max abs error vs reference too large: {err}"

    # TODO(synk): MLP_head (forward_encoder path) is not part of SCARF.forward and
    # is not implemented as a Pallas kernel here.
    print("KERNEL_OK")
</pallas_src>

<mosaic_0001>
module attributes {stable_mosaic.version = 11 : i64} {
  func.func @scarf_kernel(%arg0: i32, %arg1: memref<1x8x128xf32, #tpu.memory_space<vmem>>, %arg2: memref<128x128xf32, #tpu.memory_space<vmem>>, %arg3: memref<5x128x128xf32, #tpu.memory_space<vmem>>, %arg4: memref<10x128xf32, #tpu.memory_space<vmem>>, %arg5: memref<1x8x128xf32, #tpu.memory_space<vmem>>) attributes {dimension_semantics = [#tpu.dimension_semantics<parallel>], iteration_bounds = array<i64: 2>, scalar_prefetch = 0 : i64, scratch_operands = 0 : i64, tpu.core_type = #tpu.core_type<tc>, window_params = [{transform_indices = @transform_0, window_bounds = array<i64: 1, 8, 128>}, {pipeline_mode = #tpu.pipeline_mode<synchronous>, transform_indices = @transform_1, window_bounds = array<i64: 128, 128>}, {pipeline_mode = #tpu.pipeline_mode<synchronous>, transform_indices = @transform_2, window_bounds = array<i64: 5, 128, 128>}, {pipeline_mode = #tpu.pipeline_mode<synchronous>, transform_indices = @transform_3, window_bounds = array<i64: 10, 128>}, {transform_indices = @transform_4, window_bounds = array<i64: 1, 8, 128>}]} {
    %c0 = arith.constant 0 : index
    %c0_0 = arith.constant 0 : index
    %0 = vector.load %arg4[%c0, %c0_0] : memref<10x128xf32, #tpu.memory_space<vmem>>, vector<10x128xf32>
    %c0_1 = arith.constant 0 : index
    %c0_2 = arith.constant 0 : index
    %c0_3 = arith.constant 0 : index
    %1 = vector.load %arg1[%c0_1, %c0_2, %c0_3] : memref<1x8x128xf32, #tpu.memory_space<vmem>>, vector<1x8x128xf32>
    %2 = vector.shape_cast %1 : vector<1x8x128xf32> to vector<8x128xf32>
    %c0_4 = arith.constant 0 : index
    %c0_5 = arith.constant 0 : index
    %3 = vector.load %arg2[%c0_4, %c0_5] : memref<128x128xf32, #tpu.memory_space<vmem>>, vector<128x128xf32>
    %cst = arith.constant dense<0.000000e+00> : vector<8x128xf32>
    %4 = tpu.matmul %2, %3, %cst {dimension_numbers = #tpu.dot_dimension_numbers<[1], [0], [0], [1], [0, 0, 1, 1], [], []>} : vector<8x128xf32>, vector<128x128xf32>, vector<8x128xf32> -> vector<8x128xf32>
    %5 = vector.extract_strided_slice %0 {offsets = [0, 0], sizes = [1, 128], strides = [1, 1]} : vector<10x128xf32> to vector<1x128xf32>
    %6 = vector.extract_strided_slice %0 {offsets = [1, 0], sizes = [1, 128], strides = [1, 1]} : vector<10x128xf32> to vector<1x128xf32>
    %cst_6 = arith.constant dense<0.000000e+00> : vector<128xf32>
    %7 = vector.multi_reduction <add>, %4, %cst_6 [0] : vector<8x128xf32> to vector<128xf32>
    %8 = vector.shape_cast %7 : vector<128xf32> to vector<1x128xf32>
    %9 = arith.mulf %4, %4 : vector<8x128xf32>
    %cst_7 = arith.constant dense<0.000000e+00> : vector<128xf32>
    %10 = vector.multi_reduction <add>, %9, %cst_7 [0] : vector<8x128xf32> to vector<128xf32>
    %11 = vector.shape_cast %10 : vector<128xf32> to vector<1x128xf32>
    %cst_8 = arith.constant 1.250000e-01 : f32
    %12 = vector.broadcast %cst_8 : f32 to vector<1x128xf32>
    %13 = arith.mulf %8, %12 : vector<1x128xf32>
    %cst_9 = arith.constant 1.250000e-01 : f32
    %14 = vector.broadcast %cst_9 : f32 to vector<1x128xf32>
    %15 = arith.mulf %11, %14 : vector<1x128xf32>
    %16 = arith.mulf %13, %13 : vector<1x128xf32>
    %17 = arith.subf %15, %16 : vector<1x128xf32>
    %cst_10 = arith.constant 0.000000e+00 : f32
    %18 = vector.broadcast %cst_10 : f32 to vector<1x128xf32>
    %19 = arith.maximumf %17, %18 : vector<1x128xf32>
    %cst_11 = arith.constant 9.99999974E-6 : f32
    %20 = vector.broadcast %cst_11 : f32 to vector<1x128xf32>
    %21 = arith.addf %19, %20 : vector<1x128xf32>
    %22 = math.rsqrt %21 : vector<1x128xf32>
    %23 = arith.mulf %5, %22 : vector<1x128xf32>
    %24 = arith.mulf %13, %23 : vector<1x128xf32>
    %25 = arith.subf %6, %24 : vector<1x128xf32>
    %26 = vector.broadcast %23 : vector<1x128xf32> to vector<8x128xf32>
    %27 = arith.mulf %4, %26 : vector<8x128xf32>
    %28 = vector.broadcast %25 : vector<1x128xf32> to vector<8x128xf32>
    %29 = arith.addf %27, %28 : vector<8x128xf32>
    %cst_12 = arith.constant 0.000000e+00 : f32
    %30 = vector.broadcast %cst_12 : f32 to vector<8x128xf32>
    %31 = arith.maximumf %29, %30 : vector<8x128xf32>
    %c0_13 = arith.constant 0 : index
    %c0_14 = arith.constant 0 : index
    %c0_15 = arith.constant 0 : index
    %32 = vector.load %arg3[%c0_13, %c0_14, %c0_15] : memref<5x128x128xf32, #tpu.memory_space<vmem>>, vector<1x128x128xf32>
    %33 = vector.shape_cast %32 : vector<1x128x128xf32> to vector<128x128xf32>
    %cst_16 = arith.constant dense<0.000000e+00> : vector<8x128xf32>
    %34 = tpu.matmul %31, %33, %cst_16 {dimension_numbers = #tpu.dot_dimension_numbers<[1], [0], [0], [1], [0, 0, 1, 1], [], []>} : vector<8x128xf32>, vector<128x128xf32>, vector<8x128xf32> -> vector<8x128xf32>
    %35 = vector.extract_strided_slice %0 {offsets = [2, 0], sizes = [1, 128], strides = [1, 1]} : vector<10x128xf32> to vector<1x128xf32>
    %36 = vector.extract_strided_slice %0 {offsets = [3, 0], sizes = [1, 128], strides = [1, 1]} : vector<10x128xf32> to vector<1x128xf32>
    %cst_17 = arith.constant dense<0.000000e+00> : vector<128xf32>
    %37 = vector.multi_reduction <add>, %34, %cst_17 [0] : vector<8x128xf32> to vector<128xf32>
    %38 = vector.shape_cast %37 : vector<128xf32> to vector<1x128xf32>
    %39 = arith.mulf %34, %34 : vector<8x128xf32>
    %cst_18 = arith.constant dense<0.000000e+00> : vector<128xf32>
    %40 = vector.multi_reduction <add>, %39, %cst_18 [0] : vector<8x128xf32> to vector<128xf32>
    %41 = vector.shape_cast %40 : vector<128xf32> to vector<1x128xf32>
    %cst_19 = arith.constant 1.250000e-01 : f32
    %42 = vector.broadcast %cst_19 : f32 to vector<1x128xf32>
    %43 = arith.mulf %38, %42 : vector<1x128xf32>
    %cst_20 = arith.constant 1.250000e-01 : f32
    %44 = vector.broadcast %cst_20 : f32 to vector<1x128xf32>
    %45 = arith.mulf %41, %44 : vector<1x128xf32>
    %46 = arith.mulf %43, %43 : vector<1x128xf32>
    %47 = arith.subf %45, %46 : vector<1x128xf32>
    %cst_21 = arith.constant 0.000000e+00 : f32
    %48 = vector.broadcast %cst_21 : f32 to vector<1x128xf32>
    %49 = arith.maximumf %47, %48 : vector<1x128xf32>
    %cst_22 = arith.constant 9.99999974E-6 : f32
    %50 = vector.broadcast %cst_22 : f32 to vector<1x128xf32>
    %51 = arith.addf %49, %50 : vector<1x128xf32>
    %52 = math.rsqrt %51 : vector<1x128xf32>
    %53 = arith.mulf %35, %52 : vector<1x128xf32>
    %54 = arith.mulf %43, %53 : vector<1x128xf32>
    %55 = arith.subf %36, %54 : vector<1x128xf32>
    %56 = vector.broadcast %53 : vector<1x128xf32> to vector<8x128xf32>
    %57 = arith.mulf %34, %56 : vector<8x128xf32>
    %58 = vector.broadcast %55 : vector<1x128xf32> to vector<8x128xf32>
    %59 = arith.addf %57, %58 : vector<8x128xf32>
    %cst_23 = arith.constant 0.000000e+00 : f32
    %60 = vector.broadcast %cst_23 : f32 to vector<8x128xf32>
    %61 = arith.maximumf %59, %60 : vector<8x128xf32>
    %c1 = arith.constant 1 : index
    %c0_24 = arith.constant 0 : index
    %c0_25 = arith.constant 0 : index
    %62 = vector.load %arg3[%c1, %c0_24, %c0_25] : memref<5x128x128xf32, #tpu.memory_space<vmem>>, vector<1x128x128xf32>
    %63 = vector.shape_cast %62 : vector<1x128x128xf32> to vector<128x128xf32>
    %cst_26 = arith.constant dense<0.000000e+00> : vector<8x128xf32>
    %64 = tpu.matmul %61, %63, %cst_26 {dimension_numbers = #tpu.dot_dimension_numbers<[1], [0], [0], [1], [0, 0, 1, 1], [], []>} : vector<8x128xf32>, vector<128x128xf32>, vector<8x128xf32> -> vector<8x128xf32>
    %65 = vector.extract_strided_slice %0 {offsets = [4, 0], sizes = [1, 128], strides = [1, 1]} : vector<10x128xf32> to vector<1x128xf32>
    %66 = vector.extract_strided_slice %0 {offsets = [5, 0], sizes = [1, 128], strides = [1, 1]} : vector<10x128xf32> to vector<1x128xf32>
    %cst_27 = arith.constant dense<0.000000e+00> : vector<128xf32>
    %67 = vector.multi_reduction <add>, %64, %cst_27 [0] : vector<8x128xf32> to vector<128xf32>
    %68 = vector.shape_cast %67 : vector<128xf32> to vector<1x128xf32>
    %69 = arith.mulf %64, %64 : vector<8x128xf32>
    %cst_28 = arith.constant dense<0.000000e+00> : vector<128xf32>
    %70 = vector.multi_reduction <add>, %69, %cst_28 [0] : vector<8x128xf32> to vector<128xf32>
    %71 = vector.shape_cast %70 : vector<128xf32> to vector<1x128xf32>
    %cst_29 = arith.constant 1.250000e-01 : f32
    %72 = vector.broadcast %cst_29 : f32 to vector<1x128xf32>
    %73 = arith.mulf %68, %72 : vector<1x128xf32>
    %cst_30 = arith.constant 1.250000e-01 : f32
    %74 = vector.broadcast %cst_30 : f32 to vector<1x128xf32>
    %75 = arith.mulf %71, %74 : vector<1x128xf32>
    %76 = arith.mulf %73, %73 : vector<1x128xf32>
    %77 = arith.subf %75, %76 : vector<1x128xf32>
    %cst_31 = arith.constant 0.000000e+00 : f32
    %78 = vector.broadcast %cst_31 : f32 to vector<1x128xf32>
    %79 = arith.maximumf %77, %78 : vector<1x128xf32>
    %cst_32 = arith.constant 9.99999974E-6 : f32
    %80 = vector.broadcast %cst_32 : f32 to vector<1x128xf32>
    %81 = arith.addf %79, %80 : vector<1x128xf32>
    %82 = math.rsqrt %81 : vector<1x128xf32>
    %83 = arith.mulf %65, %82 : vector<1x128xf32>
    %84 = arith.mulf %73, %83 : vector<1x128xf32>
    %85 = arith.subf %66, %84 : vector<1x128xf32>
    %86 = vector.broadcast %83 : vector<1x128xf32> to vector<8x128xf32>
    %87 = arith.mulf %64, %86 : vector<8x128xf32>
    %88 = vector.broadcast %85 : vector<1x128xf32> to vector<8x128xf32>
    %89 = arith.addf %87, %88 : vector<8x128xf32>
    %cst_33 = arith.constant 0.000000e+00 : f32
    %90 = vector.broadcast %cst_33 : f32 to vector<8x128xf32>
    %91 = arith.maximumf %89, %90 : vector<8x128xf32>
    %c2 = arith.constant 2 : index
    %c0_34 = arith.constant 0 : index
    %c0_35 = arith.constant 0 : index
    %92 = vector.load %arg3[%c2, %c0_34, %c0_35] : memref<5x128x128xf32, #tpu.memory_space<vmem>>, vector<1x128x128xf32>
    %93 = vector.shape_cast %92 : vector<1x128x128xf32> to vector<128x128xf32>
    %cst_36 = arith.constant dense<0.000000e+00> : vector<8x128xf32>
    %94 = tpu.matmul %91, %93, %cst_36 {dimension_numbers = #tpu.dot_dimension_numbers<[1], [0], [0], [1], [0, 0, 1, 1], [], []>} : vector<8x128xf32>, vector<128x128xf32>, vector<8x128xf32> -> vector<8x128xf32>
    %95 = vector.extract_strided_slice %0 {offsets = [6, 0], sizes = [1, 128], strides = [1, 1]} : vector<10x128xf32> to vector<1x128xf32>
    %96 = vector.broadcast %95 : vector<1x128xf32> to vector<8x128xf32>
    %97 = arith.addf %94, %96 : vector<8x128xf32>
    %c3 = arith.constant 3 : index
    %c0_37 = arith.constant 0 : index
    %c0_38 = arith.constant 0 : index
    %98 = vector.load %arg3[%c3, %c0_37, %c0_38] : memref<5x128x128xf32, #tpu.memory_space<vmem>>, vector<1x128x128xf32>
    %99 = vector.shape_cast %98 : vector<1x128x128xf32> to vector<128x128xf32>
    %cst_39 = arith.constant dense<0.000000e+00> : vector<8x128xf32>
    %100 = tpu.matmul %97, %99, %cst_39 {dimension_numbers = #tpu.dot_dimension_numbers<[1], [0], [0], [1], [0, 0, 1, 1], [], []>} : vector<8x128xf32>, vector<128x128xf32>, vector<8x128xf32> -> vector<8x128xf32>
    %101 = vector.extract_strided_slice %0 {offsets = [7, 0], sizes = [1, 128], strides = [1, 1]} : vector<10x128xf32> to vector<1x128xf32>
    %102 = vector.extract_strided_slice %0 {offsets = [8, 0], sizes = [1, 128], strides = [1, 1]} : vector<10x128xf32> to vector<1x128xf32>
    %cst_40 = arith.constant dense<0.000000e+00> : vector<128xf32>
    %103 = vector.multi_reduction <add>, %100, %cst_40 [0] : vector<8x128xf32> to vector<128xf32>
    %104 = vector.shape_cast %103 : vector<128xf32> to vector<1x128xf32>
    %105 = arith.mulf %100, %100 : vector<8x128xf32>
    %cst_41 = arith.constant dense<0.000000e+00> : vector<128xf32>
    %106 = vector.multi_reduction <add>, %105, %cst_41 [0] : vector<8x128xf32> to vector<128xf32>
    %107 = vector.shape_cast %106 : vector<128xf32> to vector<1x128xf32>
    %cst_42 = arith.constant 1.250000e-01 : f32
    %108 = vector.broadcast %cst_42 : f32 to vector<1x128xf32>
    %109 = arith.mulf %104, %108 : vector<1x128xf32>
    %cst_43 = arith.constant 1.250000e-01 : f32
    %110 = vector.broadcast %cst_43 : f32 to vector<1x128xf32>
    %111 = arith.mulf %107, %110 : vector<1x128xf32>
    %112 = arith.mulf %109, %109 : vector<1x128xf32>
    %113 = arith.subf %111, %112 : vector<1x128xf32>
    %cst_44 = arith.constant 0.000000e+00 : f32
    %114 = vector.broadcast %cst_44 : f32 to vector<1x128xf32>
    %115 = arith.maximumf %113, %114 : vector<1x128xf32>
    %cst_45 = arith.constant 9.99999974E-6 : f32
    %116 = vector.broadcast %cst_45 : f32 to vector<1x128xf32>
    %117 = arith.addf %115, %116 : vector<1x128xf32>
    %118 = math.rsqrt %117 : vector<1x128xf32>
    %119 = arith.mulf %101, %118 : vector<1x128xf32>
    %120 = arith.mulf %109, %119 : vector<1x128xf32>
    %121 = arith.subf %102, %120 : vector<1x128xf32>
    %122 = vector.broadcast %119 : vector<1x128xf32> to vector<8x128xf32>
    %123 = arith.mulf %100, %122 : vector<8x128xf32>
    %124 = vector.broadcast %121 : vector<1x128xf32> to vector<8x128xf32>
    %125 = arith.addf %123, %124 : vector<8x128xf32>
    %cst_46 = arith.constant 0.000000e+00 : f32
    %126 = vector.broadcast %cst_46 : f32 to vector<8x128xf32>
    %127 = arith.maximumf %125, %126 : vector<8x128xf32>
    %c4 = arith.constant 4 : index
    %c0_47 = arith.constant 0 : index
    %c0_48 = arith.constant 0 : index
    %128 = vector.load %arg3[%c4, %c0_47, %c0_48] : memref<5x128x128xf32, #tpu.memory_space<vmem>>, vector<1x128x128xf32>
    %129 = vector.shape_cast %128 : vector<1x128x128xf32> to vector<128x128xf32>
    %cst_49 = arith.constant dense<0.000000e+00> : vector<8x128xf32>
    %130 = tpu.matmul %127, %129, %cst_49 {dimension_numbers = #tpu.dot_dimension_numbers<[1], [0], [0], [1], [0, 0, 1, 1], [], []>} : vector<8x128xf32>, vector<128x128xf32>, vector<8x128xf32> -> vector<8x128xf32>
    %131 = vector.extract_strided_slice %0 {offsets = [9, 0], sizes = [1, 128], strides = [1, 1]} : vector<10x128xf32> to vector<1x128xf32>
    %132 = vector.broadcast %131 : vector<1x128xf32> to vector<8x128xf32>
    %133 = arith.addf %130, %132 : vector<8x128xf32>
    %c0_50 = arith.constant 0 : index
    %c0_51 = arith.constant 0 : index
    %c0_52 = arith.constant 0 : index
    %134 = vector.load %arg5[%c0_50, %c0_51, %c0_52] : memref<1x8x128xf32, #tpu.memory_space<vmem>>, vector<1x8x128xf32>
    %135 = vector.shape_cast %134 : vector<1x8x128xf32> to vector<8x128xf32>
    %136 = vector.shape_cast %133 : vector<8x128xf32> to vector<1x8x128xf32>
    tpu.vector_store %arg5[%c0_50, %c0_51, %c0_52], %136 {strides = array<i32>} : memref<1x8x128xf32, #tpu.memory_space<vmem>>, vector<1x8x128xf32>,
    return
  }
  func.func @transform_0(%arg0: i32) -> (i32, i32, i32) {
    %c0_i32 = arith.constant 0 : i32
    %c0_i32_0 = arith.constant 0 : i32
    %c0_i32_1 = arith.constant 0 : i32
    return %arg0, %c0_i32, %c0_i32_0 : i32, i32, i32
  }
  func.func @transform_1(%arg0: i32) -> (i32, i32) {
    %c0_i32 = arith.constant 0 : i32
    %c0_i32_0 = arith.constant 0 : i32
    %c0_i32_1 = arith.constant 0 : i32
    return %c0_i32, %c0_i32_0 : i32, i32
  }
  func.func @transform_2(%arg0: i32) -> (i32, i32, i32) {
    %c0_i32 = arith.constant 0 : i32
    %c0_i32_0 = arith.constant 0 : i32
    %c0_i32_1 = arith.constant 0 : i32
    %c0_i32_2 = arith.constant 0 : i32
    return %c0_i32, %c0_i32_0, %c0_i32_1 : i32, i32, i32
  }
  func.func @transform_3(%arg0: i32) -> (i32, i32) {
    %c0_i32 = arith.constant 0 : i32
    %c0_i32_0 = arith.constant 0 : i32
    %c0_i32_1 = arith.constant 0 : i32
    return %c0_i32, %c0_i32_0 : i32, i32
  }
  func.func @transform_4(%arg0: i32) -> (i32, i32, i32) {
    %c0_i32 = arith.constant 0 : i32
    %c0_i32_0 = arith.constant 0 : i32
    %c0_i32_1 = arith.constant 0 : i32
    return %arg0, %c0_i32, %c0_i32_0 : i32, i32, i32
  }
}

</mosaic_0001>

<bundles_post_ra>
// kernel: tpu_custom_call.1
= control target key start
LH: loop header
LB: loop body
LE: loop exit
PB: predicated region body
PF: predicated region fallthrough
CT: control target
= control target key end

     0   :  { %9 = vsyncpa [#allocation3], 0  ;;  %s2197_s0 = inlined_call_operand.hbm [shape: f32[2,8,128], index: 0, kind: input, shape index: {}]   ;;  %s2198_s1 = inlined_call_operand.hbm [shape: f32[128,128], index: 1, kind: input, shape index: {}]   ;;  %s2199_s2 = inlined_call_operand.hbm [shape: f32[5,128,128], index: 2, kind: input, shape index: {}]   ;;  %s2200_s3 = inlined_call_operand.hbm [shape: f32[10,128], index: 3, kind: input, shape index: {}]   ;;  %s2201_s4 = inlined_call_operand.hbm [shape: f32[2,8,128], index: 4, kind: output, shape index: {}]  }
   0x1   :  { %11 = vsyncpa [#allocation3 + $0x1], 0 }
   0x2   :  { %12 = vsyncpa [#allocation6], 0 }
   0x3   :  { %13 = vsyncpa [#allocation9], 0 }
   0x4   :  { %14 = vsyncpa [#allocation4], 0 }
   0x5   :  { %16 = vsyncpa [#allocation4 + $0x1], 0  ;;  %s1839_s15 = smov 0   ;;  %s1841_s16 = smov 0  }
   0x6   :  { %s1843_s17 = smov 0   ;;  %s1845_s18 = smov 0  }
   0x7 LB: > { %s1860_s19 = sadd.s32 4294967295, %s1802_s18   ;;  %s1050_s20 = sadd.s32 4294967294, %s1802_s18   ;;  %s1802_s18 = sphi %s1845_s18, %s2224_s18   ;;  %s1798_s17 = sphi %s1843_s17, %s2223_s17   ;;  %s1794_s16 = sphi %s1841_s16, %s2222_s16   ;;  %s1790_s15 = sphi %s1839_s15, %s2221_s15  }
   0x8   : > { %p42_p0 = scmp.ne.s32.totalorder %s1794_s16, %s1790_s15  ;;  %p2202_p1 = scmp.eq.s32.totalorder %s1860_s19, 0 }
   0x9   : > { %p135_p3 = scmp.eq.s32.totalorder %s1050_s20, 1  ;;  %p1051_p5 = scmp.ge.s32.totalorder %s1802_s18, 1 }
   0xa   : > { %p1869_p4 = por %p2202_p1, %p42_p0  ;;  %p142_p7 = scmp.lt.s32.totalorder %s1802_s18, 3 }
   0xb   : > { %p1874_p6 = por %p135_p3, %p42_p0  ;;  %s1804_s24 = smov [#allocation5]  }
   0xc   : > { %s2205_s21 = scalar_select %p1869_p4, 1, 0 }
   0xd   : > { %s2206_s22 = scalar_select %p1874_p6, 1, 0 }
   0xe   : > { %p1879_p8 = pnand %p1051_p5, %p142_p7  ;;  %s154_s25 = sshll.u32 %s1804_s24, 4  ;;  %s1883_s25 = int_to_ptr.vmem [resolvable:$true] %s154_s25 }
   0xf   : > { %s1805_s27 = smov [#allocation7]   ;;  %s1806_s29 = smov [#allocation8]  }
  0x10   : > { %s2207_s23 = scalar_select %p1879_p8, 1, 0 }
  0x11   : > { %p1540_p9 = pneg %p1879_p8  ;;  %s167_s28 = sshll.u32 %s1805_s27, 4  ;;  %s1894_s28 = int_to_ptr.vmem [resolvable:$true] %s167_s28 }
  0x12   : > { %s1896_s30 = sshll.u32 %s1806_s29, 4  ;;  %s1614_s7 = scalar_lea.hbm %s2198_s1, 2048  ;;  %s181_s30 = int_to_ptr.vmem [resolvable:$true] %s1896_s30 }
  0x13   : > { %p1890_p11 = pnand %p1540_p9, %p2202_p1  ;;  %p1615_p12 = scmp.ne.s32.totalorder %s2198_s1, %s1614_s7 }
  0x14   : > { %p1621_p5 = scmp.lt.u32.totalorder %s1614_s7, %s2198_s1 }
  0x15   : > { %p1906_p13 = pneg %p1890_p11 }
  0x17   : > { %p1617_p0 = pnand %p1906_p13, %p1615_p12 }
  0x19   : > { %p1618_p3 = pneg %p1617_p0 }
  0x1b   : > { %p1623_p7 = pnand %p1621_p5, %p1618_p3 }
  0x1d   : > { %1626 = shalt.err (!%p1623_p7)
}
  0x1e   : > { %s1627_s13 = scalar_lea.vmem %s1883_s25, 2048  ;;  %p1635_p2 = scmp.lt.s32.totalorder %s1883_s25, %s1883_s25 }
  0x1f   : > { %p1628_p9 = scmp.ne.s32.totalorder %s1883_s25, %s1627_s13  ;;  %p1636_p6 = scmp.lt.s32.totalorder %s1627_s13, %s1627_s13 }
  0x21   : > { %p1630_p10 = pnand %p1628_p9, %p1906_p13  ;;  %p1637_p12 = por %p1636_p6, %p1635_p2 }
  0x23   : > { %p1631_p1 = pneg %p1630_p10 }
  0x25   : > { %p1638_p0 = pnand %p1637_p12, %p1631_p1 }
  0x27   : > { %1641 = shalt.err (!%p1638_p0)
}
  0x28   : > { %s1807_s14 = smov 128   ;;  %s1808_s20 = smov 8  }
  0x29   : > { %1543 = dma.hbm_to_vmem [thread:$0]  (!%p1890_p11), %s2198_s1, 2048, %s1883_s25, [#allocation6], %s1807_s14, %s1807_s14, %s1808_s20  }
  0x2a   : > { %s1642_s6 = scalar_lea.hbm %s2199_s2, 10240 }
  0x2b   : > { %p1643_p1 = scmp.ne.s32.totalorder %s2199_s2, %s1642_s6  ;;  %p1649_p10 = scmp.lt.u32.totalorder %s1642_s6, %s2199_s2 }
  0x2d   : > { %p1645_p2 = pnand %p1643_p1, %p1906_p13 }
  0x2f   : > { %p1646_p6 = pneg %p1645_p2 }
  0x31   : > { %p1651_p3 = pnand %p1649_p10, %p1646_p6 }
  0x33   : > { %1654 = shalt.err (!%p1651_p3)
}
  0x34   : > { %s1655_s25 = scalar_lea.vmem %s1894_s28, 10240  ;;  %p1663_p12 = scmp.lt.s32.totalorder %s1894_s28, %s1894_s28 }
  0x35   : > { %p1656_p5 = scmp.ne.s32.totalorder %s1894_s28, %s1655_s25  ;;  %p1664_p0 = scmp.lt.s32.totalorder %s1655_s25, %s1655_s25 }
  0x37   : > { %p1658_p7 = pnand %p1656_p5, %p1906_p13  ;;  %p1665_p1 = por %p1664_p0, %p1663_p12 }
  0x39   : > { %p1659_p9 = pneg %p1658_p7 }
  0x3b   : > { %p1666_p2 = pnand %p1665_p1, %p1659_p9 }
  0x3d   : > { %1669 = shalt.err (!%p1666_p2)
}
  0x3e   : > { %1546 = dma.hbm_to_vmem [thread:$0]  (!%p1890_p11), %s2199_s2, 10240, %s1894_s28, [#allocation6], %s1807_s14, %s1807_s14, %s1808_s20  }
  0x3f   : > { %s1670_s29 = scalar_lea.hbm %s2200_s3, 256 }
  0x40   : > { %p1671_p6 = scmp.ne.s32.totalorder %s2200_s3, %s1670_s29  ;;  %p1677_p5 = scmp.lt.u32.totalorder %s1670_s29, %s2200_s3 }
  0x42   : > { %p1673_p10 = pnand %p1671_p6, %p1906_p13 }
  0x44   : > { %p1674_p3 = pneg %p1673_p10 }
  0x46   : > { %p1679_p7 = pnand %p1677_p5, %p1674_p3 }
  0x48   : > { %1682 = shalt.err (!%p1679_p7)
}
  0x49   : > { %s1683_s9 = scalar_lea.vmem %s181_s30, 256  ;;  %p1691_p1 = scmp.lt.s32.totalorder %s181_s30, %s181_s30 }
  0x4a   : > { %p1684_p9 = scmp.ne.s32.totalorder %s181_s30, %s1683_s9  ;;  %p1692_p2 = scmp.lt.s32.totalorder %s1683_s9, %s1683_s9 }
  0x4c   : > { %p1686_p12 = pnand %p1684_p9, %p1906_p13  ;;  %p1693_p4 = por %p1692_p2, %p1691_p1 }
  0x4e   : > { %p1687_p0 = pneg %p1686_p12 }
  0x50   : > { %p1694_p8 = pnand %p1693_p4, %p1687_p0 }
  0x52   : > { %1697 = shalt.err (!%p1694_p8)
}
  0x53   : > { %1549 = dma.hbm_to_vmem [thread:$0]  (!%p1890_p11), %s2200_s3, 256, %s181_s30, [#allocation9], %s1807_s14, %s1807_s14, %s1808_s20  }
  0x54   : > { %s1979_s10 = sadd.s32 1, %s1802_s18   ;;  %s29_s25 = sadd.s32 1, %s1798_s17 }
  0x55   : > { %s26_s26 = ssub.s32 %s1802_s18, %s1979_s10  ;;  %p36_p8 = scmp.ne.s32.totalorder %s1798_s17, %s1794_s16 }
  0x56   : > { %p27_p4 = scmp.eq.s32.totalorder %s26_s26, 0  ;;  %p37_p13 = scmp.eq.s32.totalorder %s1802_s18, 0 }
  0x57   : > { %p1561_p6 = scmp.lt.s32.totalorder %s1802_s18, 2  ;;  %p2210_p3 = scmp.eq.s32.totalorder %s1860_s19, 1 }
  0x58   : > { %s1989_s12 = scalar_select %p27_p4, %s1798_s17, %s29_s25  }
  0x59   : > { %p38_p10 = por %p37_p13, %p36_p8  ;;  %p1993_p5 = por %p2210_p3, %p36_p8 }
  0x5a   : > { %s194_s24 = sand.u32 1, %s1798_s17   ;;  %s1057_s27 = sshll.u32 %s1802_s18, 7 }
  0x5b   : > { %s1056_s30 = sshll.u32 %s194_s24, 3  ;;  %s2002_s29 = scalar_lea.hbm %s2197_s0, %s1057_s27 }
  0x5c   : > { %s198_s5 = scalar_lea.vmem [#allocation2], %s1056_s30  ;;  %p2004_p11 = pnand %p1561_p6, %p38_p10 }
  0x5d   : > { %s205_s6 = sshll.u32 %s198_s5, 4  ;;  %s195_s8 = scalar_lea.sflag [#allocation3], %s194_s24  ;;  %s2008_s6 = int_to_ptr.vmem [resolvable:$true] %s205_s6 }
  0x5e   : > { %s1698_s9 = scalar_lea.hbm %s2002_s29, 128  ;;  %p1700_p9 = pneg %p2004_p11 }
  0x5f   : > { %p1699_p7 = scmp.ne.s32.totalorder %s2002_s29, %s1698_s9  ;;  %s1703_s26 = scalar_lea.hbm %s2197_s0, 256 }
  0x60   : > { %p1704_p1 = scmp.lt.u32.totalorder %s2002_s29, %s2197_s0  ;;  %p1705_p2 = scmp.lt.u32.totalorder %s1703_s26, %s1698_s9 }
  0x61   : > { %p1701_p12 = pnand %p1700_p9, %p1699_p7  ;;  %p1707_p8 = scmp.lt.u32.totalorder %s1698_s9, %s2002_s29 }
  0x62   : > { %p1706_p4 = por %p1705_p2, %p1704_p1 }
  0x63   : > { %p1702_p0 = pneg %p1701_p12 }
  0x64   : > { %p1708_p13 = por %p1707_p8, %p1706_p4 }
  0x66   : > { %p1709_p6 = pnand %p1708_p13, %p1702_p0 }
  0x68   : > { %1712 = shalt.err (!%p1709_p6)
}
  0x69   : > { %s1713_s24 = scalar_lea.vmem %s2008_s6, 128  ;;  %s1809_s30 = smov [#allocation2]  }
  0x6a   : > { %p1714_p10 = scmp.ne.s32.totalorder %s2008_s6, %s1713_s24  ;;  %s1718_s14 = sshll.u32 %s1809_s30, 4  ;;  %s1719_s14 = int_to_ptr.vmem [resolvable:$false] %s1718_s14 }
  0x6b   : > { %s1720_s20 = scalar_lea.vmem %s1719_s14, 256  ;;  %p1721_p12 = scmp.lt.s32.totalorder %s2008_s6, %s1719_s14 }
  0x6c   : > { %p1716_p3 = pnand %p1714_p10, %p1700_p9  ;;  %p1722_p1 = scmp.lt.s32.totalorder %s1720_s20, %s1713_s24 }
  0x6e   : > { %p1717_p7 = pneg %p1716_p3  ;;  %p1723_p2 = por %p1722_p1, %p1721_p12 }
  0x70   : > { %p1724_p4 = pnand %p1723_p2, %p1717_p7 }
  0x72   : > { %1727 = shalt.err (!%p1724_p4)
}
  0x73   : > { %1553 = dma.hbm_to_vmem [thread:$0]  (!%p2004_p11), %s2002_s29, 128, %s2008_s6, %s195_s8  }
  0x74   : > { %p2213_p0 = scmp.ne.s32.totalorder %s2207_s23, 0 }
  0x75   : > { %s2038_s5 = sand.u32 (!%p2213_p0), 1, %s1794_s16   ;;  %p2214_p9 = scmp.ne.s32.totalorder (!%p2213_p0), %s2205_s21, 0 }
  0x76   : > { %214 = sbr.rel (%p2213_p0) target bundleno = 1646 (0x66e), region = 36  ;;  %s1059_s9 = sshll.u32 (!%p2213_p0), %s2038_s5, 3 }
  0x77   : > { %s217_s28 = scalar_lea.sflag (!%p2213_p0), [#allocation3], %s2038_s5  ;;  %s2044_s11 = scalar_lea.vmem (!%p2213_p0), [#allocation2], %s1059_s9 }
  0x7d   : > { %1773 = dma.done.wait (%p2214_p9), %s217_s28, 128  }
  0x7e   : > { %1775 = vsyncadd (%p2214_p9), %s217_s28, 4294967168  ;;  %p2215_p11 = scmp.eq.s32.totalorder %s1860_s19, 0 }
  0x80   : > { %1777 = dma.done.wait (%p2215_p11), [#allocation6], 12288   ;;  %p2216_p8 = pmov %p2215_p11 }
  0x82   : > { %1779 = vsyncadd (%p2216_p8), [#allocation6], 4294955008  ;;  %p2217_p13 = pmov %p2216_p8 }
  0x83   : > { %p2218_p6 = pmov %p2216_p8 }
  0x84   : > { %1781 = dma.done.wait (%p2217_p13), [#allocation9], 256  }
  0x85   : > { %1783 = vsyncadd (%p2218_p6), [#allocation9], 4294967040  ;;  %v1810_v0 = vmov 0.0|0.0   ;;  %vm1811_vm0 = vmmov 0   ;;  %v1812_v1 = vmov 0.0   ;;  %v260_v2 = vld [vmem:[#allocation5] sm:$0xff] }
  0x86   : > { %1380 = vmatprep.subr.bf16.mxu0 %v1810_v0  ;;  %1202 = vmatprep.mubr.msk.f32.mxu0 %vm1811_vm0, %v1812_v1  ;;  %v261_v3 = vld [vmem:[#allocation5 + $0x8] sm:$0xff]  ;;  %v262_v4 = vld [vmem:[#allocation5 + $0x10] sm:$0xff]  ;;  %v263_v6 = vld [vmem:[#allocation5 + $0x18] sm:$0xff]  ;;  %s1065_s21 = sshll.u32 %s1860_s19, 7  ;;  %s256_s23 = scalar_lea.vmem [#allocation10], %s1059_s9 }
  0x87   : > { %1404 = vmatprep.subr.bf16.mxu1 %v1810_v0  ;;  %1237 = vmatprep.mubr.msk.f32.mxu1 %vm1811_vm0, %v1812_v1  ;;  %v1381_v5 = vpack.c.bf16 %v261_v3, %v260_v2  ;;  %v1384_v7 = vpack.c.bf16 %v263_v6, %v262_v4  ;;  %v264_v8 = vld [vmem:[#allocation5 + $0x20] sm:$0xff]  ;;  %v265_v9 = vld [vmem:[#allocation5 + $0x28] sm:$0xff]  ;;  %v266_v11 = vld [vmem:[#allocation5 + $0x30] sm:$0xff]  ;;  %s951_s29 = sshll.u32 %s256_s23, 4  ;;  %s2153_s8 = scalar_lea.hbm %s2201_s4, %s1065_s21  ;;  %s2155_s29 = int_to_ptr.vmem [resolvable:$true] %s951_s29 }
  0x88   : > { %v1387_v10 = vpack.c.bf16 %v265_v9, %v264_v8  ;;  %v267_v12 = vld [vmem:[#allocation5 + $0x38] sm:$0xff]  ;;  %v268_v14 = vld [vmem:[#allocation5 + $0x40] sm:$0xff]  ;;  %v269_v15 = vld [vmem:[#allocation5 + $0x48] sm:$0xff]  ;;  %s938_s26 = scalar_lea.sflag [#allocation4], %s2038_s5  ;;  %s1728_s25 = scalar_lea.vmem %s2155_s29, 128 }
  0x89   : > { %1382 = vmatpush3.bf16.msra.mxu0 %v1381_v5  ;;  %v1390_v13 = vpack.c.bf16 %v267_v12, %v266_v11  ;;  %v1393_v16 = vpack.c.bf16 %v269_v15, %v268_v14  ;;  %v270_v17 = vld [vmem:[#allocation5 + $0x50] sm:$0xff]  ;;  %v271_v18 = vld [vmem:[#allocation5 + $0x58] sm:$0xff]  ;;  %v272_v20 = vld [vmem:[#allocation5 + $0x60] sm:$0xff]  ;;  %p1729_p10 = scmp.ne.s32.totalorder %s2155_s29, %s1728_s25  ;;  %s1813_s19 = smov [#allocation10]  }
  0x8a   : > { %1383 = vmatprep.subr.bf16.mxu0 %v1810_v0  ;;  %v1396_v19 = vpack.c.bf16 %v271_v18, %v270_v17  ;;  %v273_v21 = vld [vmem:[#allocation5 + $0x68] sm:$0xff]  ;;  %v274_v23 = vld [vmem:[#allocation5 + $0x70] sm:$0xff]  ;;  %v275_v24 = vld [vmem:[#allocation5 + $0x78] sm:$0xff]  ;;  %s1732_s27 = sshll.u32 %s1813_s19, 4  ;;  %s1733_s27 = int_to_ptr.vmem [resolvable:$false] %s1732_s27 }
  0x8b   : > { %v1399_v22 = vpack.c.bf16 %v273_v21, %v272_v20  ;;  %v1402_v25 = vpack.c.bf16 %v275_v24, %v274_v23  ;;  %v259_v26 = vld [vmem:[%s2044_s11] sm:$0xff]  ;;  %v383_v27 = vld [vmem:[#allocation7] sm:$0xff]  ;;  %v384_v28 = vld [vmem:[#allocation7 + $0x8] sm:$0xff]  ;;  %p1730_p3 = pnand %p1729_p10, %p1993_p5  ;;  %s1734_s24 = scalar_lea.vmem %s1733_s27, 256 }
  0x8c   : > { %v1405_v29 = vpack.c.bf16 %v384_v28, %v383_v27  ;;  %v385_v30 = vld [vmem:[#allocation7 + $0x10] sm:$0xff]  ;;  %v386_v31 = vld [vmem:[#allocation7 + $0x18] sm:$0xff]  ;;  %v387_v33 = vld [vmem:[#allocation7 + $0x20] sm:$0xff]  ;;  %p1735_p12 = scmp.lt.s32.totalorder %s2155_s29, %s1733_s27  ;;  %p1736_p1 = scmp.lt.s32.totalorder %s1734_s24, %s1728_s25 }
  0x8d   : > { %1385 = vmatpush3.bf16.msra.mxu0 %v1384_v7  ;;  %v1408_v32 = vpack.c.bf16 %v386_v31, %v385_v30  ;;  %v388_v34 = vld [vmem:[#allocation7 + $0x28] sm:$0xff]  ;;  %v389_v36 = vld [vmem:[#allocation7 + $0x30] sm:$0xff]  ;;  %v390_v37 = vld [vmem:[#allocation7 + $0x38] sm:$0xff]  ;;  %p1731_p7 = pneg %p1730_p3 }
  0x8e   : > { %1386 = vmatprep.subr.bf16.mxu0 %v1810_v0  ;;  %1406 = vmatpush3.bf16.msra.mxu1 %v1405_v29  ;;  %v1411_v35 = vpack.c.bf16 %v388_v34, %v387_v33  ;;  %v1414_v38 = vpack.c.bf16 %v390_v37, %v389_v36  ;;  %v391_v39 = vld [vmem:[#allocation7 + $0x40] sm:$0xff]  ;;  %v392_v40 = vld [vmem:[#allocation7 + $0x48] sm:$0xff]  ;;  %v393_v42 = vld [vmem:[#allocation7 + $0x50] sm:$0xff]  ;;  %p1737_p2 = por %p1736_p1, %p1735_p12 }
  0x8f   : > { %1407 = vmatprep.subr.bf16.mxu1 %v1810_v0  ;;  %v1417_v41 = vpack.c.bf16 %v392_v40, %v391_v39  ;;  %v394_v43 = vld [vmem:[#allocation7 + $0x58] sm:$0xff]  ;;  %v395_v45 = vld [vmem:[#allocation7 + $0x60] sm:$0xff]  ;;  %v396_v46 = vld [vmem:[#allocation7 + $0x68] sm:$0xff] }
  0x90   : > { %v1420_v44 = vpack.c.bf16 %v394_v43, %v393_v42  ;;  %v397_v47 = vld [vmem:[#allocation7 + $0x70] sm:$0xff]  ;;  %v1423_v48 = vpack.c.bf16 %v396_v46, %v395_v45  ;;  %v398_v49 = vld [vmem:[#allocation7 + $0x78] sm:$0xff]  ;;  %v2085_v12 = vld [vmem:[#allocation8] sm:$0xff]  ;;  %p1738_p4 = pnand %p1737_p2, %p1731_p7 }
  0x91   : > { %1388 = vmatpush3.bf16.msra.mxu0 %v1387_v10  ;;  %v1426_v50 = vpack.c.bf16 %v398_v49, %v397_v47  ;;  %v372_v10 = vlaneseq  ;;  %v509_v28 = vld [vmem:[#allocation7 + $0x90] sm:$0xff]  ;;  %v510_v29 = vld [vmem:[#allocation7 + $0x98] sm:$0xff]  ;;  %v511_v31 = vld [vmem:[#allocation7 + $0xa0] sm:$0xff] }
  0x92   : > { %1389 = vmatprep.subr.bf16.mxu0 %v1810_v0  ;;  %1409 = vmatpush3.bf16.msra.mxu1 %v1408_v32  ;;  %v1432_v30 = vpack.c.bf16 %v510_v29, %v509_v28  ;;  %v512_v32 = vld [vmem:[#allocation7 + $0xa8] sm:$0xff]  ;;  %v513_v34 = vld [vmem:[#allocation7 + $0xb0] sm:$0xff]  ;;  %v515_v37 = vld [vmem:[#allocation7 + $0xc0] sm:$0xff] }
  0x93   : > { %1410 = vmatprep.subr.bf16.mxu1 %v1810_v0  ;;  %v2083_v11 = vshrl.u32 %v372_v10, 7  ;;  %v1435_v33 = vpack.c.bf16 %v512_v32, %v511_v31  ;;  %v517_v40 = vld [vmem:[#allocation7 + $0xd0] sm:$0xff]  ;;  %v519_v43 = vld [vmem:[#allocation7 + $0xe0] sm:$0xff]  ;;  %v522_v47 = vld [vmem:[#allocation7 + $0xf8] sm:$0xff] }
  0x94   : > { %v521_v46 = vld [vmem:[#allocation7 + $0xf0] sm:$0xff]  ;;  %v634_v28 = vld [vmem:[#allocation7 + $0x118] sm:$0xff]  ;;  %v636_v31 = vld [vmem:[#allocation7 + $0x128] sm:$0xff] }
  0x95   : > { %1391 = vmatpush3.bf16.msra.mxu0 %v1390_v13  ;;  %v374_v15 = vsub.s32 0, %v2083_v11  ;;  %v497_v10 = vsub.s32 2, %v2083_v11 }
  0x96   : > { %1392 = vmatprep.subr.bf16.mxu0 %v1810_v0  ;;  %1412 = vmatpush3.bf16.msra.mxu1 %v1411_v35  ;;  %v514_v35 = vld [vmem:[#allocation7 + $0xb8] sm:$0xff] }
  0x97   : > { %1413 = vmatprep.subr.bf16.mxu1 %v1810_v0  ;;  %v1438_v36 = vpack.c.bf16 %v514_v35, %v513_v34  ;;  %v638_v34 = vld [vmem:[#allocation7 + $0x138] sm:$0xff] }
  0x99   : > { %1394 = vmatpush3.bf16.msra.mxu0 %v1393_v16 }
  0x9a   : > { %1395 = vmatprep.subr.bf16.mxu0 %v1810_v0  ;;  %1415 = vmatpush3.bf16.msra.mxu1 %v1414_v38  ;;  %v516_v38 = vld [vmem:[#allocation7 + $0xc8] sm:$0xff] }
  0x9b   : > { %1416 = vmatprep.subr.bf16.mxu1 %v1810_v0  ;;  %v1441_v39 = vpack.c.bf16 %v516_v38, %v515_v37  ;;  %v640_v37 = vld [vmem:[#allocation7 + $0x148] sm:$0xff] }
  0x9d   : > { %1397 = vmatpush3.bf16.msra.mxu0 %v1396_v19  ;;  %v379_v19 = vsub.s32 1, %v2083_v11 }
  0x9e   : > { %1398 = vmatprep.subr.bf16.mxu0 %v1810_v0  ;;  %1418 = vmatpush3.bf16.msra.mxu1 %v1417_v41  ;;  %v518_v41 = vld [vmem:[#allocation7 + $0xd8] sm:$0xff] }
  0x9f   : > { %1419 = vmatprep.subr.bf16.mxu1 %v1810_v0  ;;  %v1444_v42 = vpack.c.bf16 %v518_v41, %v517_v40  ;;  %v642_v40 = vld [vmem:[#allocation7 + $0x158] sm:$0xff] }
  0xa1   : > { %1400 = vmatpush3.bf16.msra.mxu0 %v1399_v22 }
  0xa2   : > { %1401 = vmatprep.subr.bf16.mxu0 %v1810_v0  ;;  %1421 = vmatpush3.bf16.msra.mxu1 %v1420_v44  ;;  %v520_v44 = vld [vmem:[#allocation7 + $0xe8] sm:$0xff] }
  0xa3   : > { %1422 = vmatprep.subr.bf16.mxu1 %v1810_v0  ;;  %v1447_v45 = vpack.c.bf16 %v520_v44, %v519_v43  ;;  %v644_v43 = vld [vmem:[#allocation7 + $0x168] sm:$0xff] }
  0xa5   : > { %1403 = vmatpush3.bf16.msra.mxu0 %v1402_v25  ;;  %v507_v25 = vld [vmem:[#allocation7 + $0x80] sm:$0xff] }
  0xa6   : > { %1428 = vmatprep.subr.bf16.mxu0 %v1810_v0  ;;  %1424 = vmatpush3.bf16.msra.mxu1 %v1423_v48  ;;  %v1450_v48 = vpack.c.bf16 %v522_v47, %v521_v46  ;;  %v646_v46 = vld [vmem:[#allocation7 + $0x178] sm:$0xff] }
  0xa7   : > { %1425 = vmatprep.subr.bf16.mxu1 %v1810_v0 }
  0xa8   : > { %1203 = vmatmul.mubr.f32.vlgmr.msra.gmra.mrb[0].mxu0 %v259_v26  ;;  %v508_v26 = vld [vmem:[#allocation7 + $0x88] sm:$0xff] }
  0xa9   : > { %1272 = vmatprep.mubr.msk.f32.mxu0 %vm1811_vm0, %v1812_v1  ;;  %v1429_v27 = vpack.c.bf16 %v508_v26, %v507_v25  ;;  %v632_v25 = vld [vmem:[#allocation7 + $0x108] sm:$0xff] }
  0xaa   : > { %1427 = vmatpush3.bf16.msra.mxu1 %v1426_v50 }
  0xab   : > { %1452 = vmatprep.subr.bf16.mxu1 %v1810_v0  ;;  %1430 = vmatpush3.bf16.msra.mxu0 %v1429_v27  ;;  %v633_v27 = vld [vmem:[#allocation7 + $0x110] sm:$0xff] }
  0xac   : > { %1431 = vmatprep.subr.bf16.mxu0 %v1810_v0  ;;  %v1456_v29 = vpack.c.bf16 %v634_v28, %v633_v27 }
  0xaf   : > { %1433 = vmatpush3.bf16.msra.mxu0 %v1432_v30  ;;  %v635_v30 = vld [vmem:[#allocation7 + $0x120] sm:$0xff] }
  0xb0   : > { %1434 = vmatprep.subr.bf16.mxu0 %v1810_v0  ;;  %v1459_v32 = vpack.c.bf16 %v636_v31, %v635_v30 }
  0xb3   : > { %1436 = vmatpush3.bf16.msra.mxu0 %v1435_v33  ;;  %v637_v33 = vld [vmem:[#allocation7 + $0x130] sm:$0xff] }
  0xb4   : > { %1437 = vmatprep.subr.bf16.mxu0 %v1810_v0  ;;  %v1462_v35 = vpack.c.bf16 %v638_v34, %v637_v33  ;;  %v621_v34 = vsub.s32 4, %v2083_v11 }
  0xb7   : > { %1439 = vmatpush3.bf16.msra.mxu0 %v1438_v36  ;;  %v639_v36 = vld [vmem:[#allocation7 + $0x140] sm:$0xff] }
  0xb8   : > { %1440 = vmatprep.subr.bf16.mxu0 %v1810_v0  ;;  %v1465_v38 = vpack.c.bf16 %v640_v37, %v639_v36 }
  0xbb   : > { %1442 = vmatpush3.bf16.msra.mxu0 %v1441_v39  ;;  %v641_v39 = vld [vmem:[#allocation7 + $0x150] sm:$0xff] }
  0xbc   : > { %1443 = vmatprep.subr.bf16.mxu0 %v1810_v0  ;;  %v1468_v41 = vpack.c.bf16 %v642_v40, %v641_v39 }
  0xbf   : > { %1445 = vmatpush3.bf16.msra.mxu0 %v1444_v42  ;;  %v643_v42 = vld [vmem:[#allocation7 + $0x160] sm:$0xff] }
  0xc0   : > { %1446 = vmatprep.subr.bf16.mxu0 %v1810_v0  ;;  %v1471_v44 = vpack.c.bf16 %v644_v43, %v643_v42 }
  0xc3   : > { %1448 = vmatpush3.bf16.msra.mxu0 %v1447_v45  ;;  %v645_v45 = vld [vmem:[#allocation7 + $0x170] sm:$0xff] }
  0xc4   : > { %1449 = vmatprep.subr.bf16.mxu0 %v1810_v0  ;;  %v1474_v47 = vpack.c.bf16 %v646_v46, %v645_v45  ;;  %v737_v45 = vld [vmem:[#allocation7 + $0x1f8] sm:$0xff] }
  0xc7   : > { %1451 = vmatpush3.bf16.msra.mxu0 %v1450_v48  ;;  %v722_v48 = vld [vmem:[#allocation7 + $0x180] sm:$0xff] }
  0xc8   : > { %1476 = vmatprep.subr.bf16.mxu0 %v1810_v0 }
 0x17b   : > { %v342_v51 = vpop.f32.mrb[0].mxu0 }
 0x17c   : > { %v346_v52 = vrot.slane %v342_v51, 4  ;;  %v352_v53 = vmul.f32 %v342_v51, %v342_v51  ;;  %v1204_v54 = vpop.f32.mrb[1].mxu0 }
 0x17e   : > { %v347_v55 = vadd.f32 %v346_v52, %v342_v51  ;;  %v353_v56 = vrot.slane %v352_v53, 4 }
 0x180   : > { %v348_v57 = vrot.slane %v347_v55, 2  ;;  %v354_v58 = vadd.f32 %v353_v56, %v352_v53 }
 0x182   : > { %v349_v59 = vadd.f32 %v348_v57, %v347_v55  ;;  %v355_v60 = vrot.slane %v354_v58, 2 }
 0x184   : > { %v350_v61 = vrot.slane %v349_v59, 1  ;;  %v356_v62 = vadd.f32 %v355_v60, %v354_v58 }
 0x186   : > { %v351_v63 = vadd.f32 %v350_v61, %v349_v59  ;;  %v357_v2 = vrot.slane %v356_v62, 1 }
 0x188   : > { %v358_v3 = vadd.f32 %v357_v2, %v356_v62  ;;  %v359_v4 = vmul.f32 0.125, %v351_v63 }
 0x18a   : > { %v360_v5 = vmul.f32 0.125, %v358_v3  ;;  %v361_v6 = vmul.f32 %v359_v4, %v359_v4 }
 0x18c   : > { %v362_v7 = vsub.f32 %v360_v5, %v361_v6 }
 0x18e   : > { %v363_v8 = vmax.f32 %v362_v7, 0.0 }
 0x190   : > { %v364_v9 = vadd.f32 1e-05, %v363_v8 }
 0x192   : > { %1606 = vrsqrt.f32 %v364_v9 }
 0x19c   : > { %v1607_v13 = vpop.eup %1606 }
 0x19d   : > { %v366_v14 = vmul.f32 %v1607_v13, %v2085_v12 }
 0x19f   : > { %v367_v16 = vmul.f32 %v366_v14, %v359_v4  ;;  %v375_v17 = vrot.slane %v366_v14, %v374_v15 }
 0x1a1   : > { %v369_v18 = vrot.slane %v367_v16, 7  ;;  %v376_v21 = vmul.f32 %v375_v17, %v342_v51  ;;  %v502_v17 = vsub.s32 3, %v2083_v11 }
 0x1a3   : > { %v371_v20 = vsub.f32 %v2085_v12, %v369_v18 }
 0x1a5   : > { %v380_v22 = vrot.slane %v371_v20, %v379_v19 }
 0x1a7   : > { %v381_v23 = vadd.f32 %v380_v22, %v376_v21 }
 0x1a9   : > { %v382_v24 = vmax.f32 %v381_v23, 0.0 }
 0x1ab   : > { %1238 = vmatmul.mubr.f32.vlgmr.msra.gmra.mrb[0].mxu1 %v382_v24  ;;  %v631_v24 = vld [vmem:[#allocation7 + $0x100] sm:$0xff] }
 0x1ac   : > { %1307 = vmatprep.mubr.msk.f32.mxu1 %vm1811_vm0, %v1812_v1  ;;  %v1453_v26 = vpack.c.bf16 %v632_v25, %v631_v24 }
 0x1ae   : > { %1454 = vmatpush3.bf16.msra.mxu1 %v1453_v26 }
 0x1af   : > { %1455 = vmatprep.subr.bf16.mxu1 %v1810_v0 }
 0x1b2   : > { %1457 = vmatpush3.bf16.msra.mxu1 %v1456_v29 }
 0x1b3   : > { %1458 = vmatprep.subr.bf16.mxu1 %v1810_v0 }
 0x1b6   : > { %1460 = vmatpush3.bf16.msra.mxu1 %v1459_v32 }
 0x1b7   : > { %1461 = vmatprep.subr.bf16.mxu1 %v1810_v0 }
 0x1ba   : > { %1463 = vmatpush3.bf16.msra.mxu1 %v1462_v35 }
 0x1bb   : > { %1464 = vmatprep.subr.bf16.mxu1 %v1810_v0 }
 0x1be   : > { %1466 = vmatpush3.bf16.msra.mxu1 %v1465_v38  ;;  %v626_v38 = vsub.s32 5, %v2083_v11 }
 0x1bf   : > { %1467 = vmatprep.subr.bf16.mxu1 %v1810_v0 }
 0x1c2   : > { %1469 = vmatpush3.bf16.msra.mxu1 %v1468_v41 }
 0x1c3   : > { %1470 = vmatprep.subr.bf16.mxu1 %v1810_v0 }
 0x1c6   : > { %1472 = vmatpush3.bf16.msra.mxu1 %v1471_v44  ;;  %v736_v44 = vld [vmem:[#allocation7 + $0x1f0] sm:$0xff] }
 0x1c7   : > { %1473 = vmatprep.subr.bf16.mxu1 %v1810_v0  ;;  %v1498_v46 = vpack.c.bf16 %v737_v45, %v736_v44 }
 0x1ca   : > { %1475 = vmatpush3.bf16.msra.mxu1 %v1474_v47  ;;  %v649_v47 = vsub.s32 6, %v2083_v11 }
 0x1cb   : > { %1500 = vmatprep.subr.bf16.mxu1 %v1810_v0 }
 0x27e   : > { %v465_v49 = vpop.f32.mrb[0].mxu1 }
 0x27f   : > { %v469_v50 = vrot.slane %v465_v49, 4  ;;  %v475_v51 = vmul.f32 %v465_v49, %v465_v49  ;;  %v1239_v52 = vpop.f32.mrb[1].mxu1 }
 0x280   : > { %v725_v52 = vld [vmem:[#allocation7 + $0x198] sm:$0xff] }
 0x281   : > { %v470_v53 = vadd.f32 %v469_v50, %v465_v49  ;;  %v476_v54 = vrot.slane %v475_v51, 4  ;;  %v724_v50 = vld [vmem:[#allocation7 + $0x190] sm:$0xff] }
 0x283   : > { %v471_v55 = vrot.slane %v470_v53, 2  ;;  %v477_v56 = vadd.f32 %v476_v54, %v475_v51  ;;  %v726_v54 = vld [vmem:[#allocation7 + $0x1a0] sm:$0xff] }
 0x285   : > { %v472_v57 = vadd.f32 %v471_v55, %v470_v53  ;;  %v478_v58 = vrot.slane %v477_v56, 2  ;;  %v1480_v53 = vpack.c.bf16 %v725_v52, %v724_v50  ;;  %v727_v55 = vld [vmem:[#allocation7 + $0x1a8] sm:$0xff]  ;;  %v846_v52 = vld [vmem:[#allocation7 + $0x200] sm:$0xff] }
 0x287   : > { %v473_v59 = vrot.slane %v472_v57, 1  ;;  %v479_v60 = vadd.f32 %v478_v58, %v477_v56  ;;  %v1483_v56 = vpack.c.bf16 %v727_v55, %v726_v54  ;;  %v729_v58 = vld [vmem:[#allocation7 + $0x1b8] sm:$0xff]  ;;  %v848_v55 = vld [vmem:[#allocation7 + $0x210] sm:$0xff] }
 0x289   : > { %v474_v61 = vadd.f32 %v473_v59, %v472_v57  ;;  %v480_v62 = vrot.slane %v479_v60, 1  ;;  %v728_v57 = vld [vmem:[#allocation7 + $0x1b0] sm:$0xff] }
 0x28a   : > { %v1486_v59 = vpack.c.bf16 %v729_v58, %v728_v57  ;;  %v850_v57 = vld [vmem:[#allocation7 + $0x220] sm:$0xff]  ;;  %v851_v58 = vld [vmem:[#allocation7 + $0x228] sm:$0xff] }
 0x28b   : > { %v481_v63 = vadd.f32 %v480_v62, %v479_v60  ;;  %v482_v2 = vmul.f32 0.125, %v474_v61  ;;  %v730_v60 = vld [vmem:[#allocation7 + $0x1c0] sm:$0xff]  ;;  %v731_v61 = vld [vmem:[#allocation7 + $0x1c8] sm:$0xff] }
 0x28c   : > { %v1489_v62 = vpack.c.bf16 %v731_v61, %v730_v60  ;;  %v852_v60 = vld [vmem:[#allocation7 + $0x230] sm:$0xff]  ;;  %v853_v61 = vld [vmem:[#allocation7 + $0x238] sm:$0xff] }
 0x28d   : > { %v483_v3 = vmul.f32 0.125, %v481_v63  ;;  %v484_v4 = vmul.f32 %v482_v2, %v482_v2  ;;  %v732_v63 = vld [vmem:[#allocation7 + $0x1d0] sm:$0xff] }
 0x28f   : > { %v485_v5 = vsub.f32 %v483_v3, %v484_v4  ;;  %v734_v4 = vld [vmem:[#allocation7 + $0x1e0] sm:$0xff] }
 0x291   : > { %v486_v6 = vmax.f32 %v485_v5, 0.0  ;;  %v735_v5 = vld [vmem:[#allocation7 + $0x1e8] sm:$0xff] }
 0x293   : > { %v487_v7 = vadd.f32 1e-05, %v486_v6  ;;  %v1495_v6 = vpack.c.bf16 %v735_v5, %v734_v4  ;;  %v856_v4 = vld [vmem:[#allocation7 + $0x250] sm:$0xff]  ;;  %v857_v5 = vld [vmem:[#allocation7 + $0x258] sm:$0xff] }
 0x295   : > { %1608 = vrsqrt.f32 %v487_v7 }
 0x29f   : > { %v1609_v8 = vpop.eup %1608 }
 0x2a0   : > { %v489_v9 = vmul.f32 %v1609_v8, %v2085_v12 }
 0x2a2   : > { %v490_v13 = vmul.f32 %v489_v9, %v482_v2  ;;  %v498_v16 = vrot.slane %v489_v9, %v497_v10  ;;  %v733_v2 = vld [vmem:[#allocation7 + $0x1d8] sm:$0xff] }
 0x2a3   : > { %v1492_v3 = vpack.c.bf16 %v733_v2, %v732_v63  ;;  %v854_v63 = vld [vmem:[#allocation7 + $0x240] sm:$0xff]  ;;  %v855_v2 = vld [vmem:[#allocation7 + $0x248] sm:$0xff] }
 0x2a4   : > { %v492_v14 = vrot.slane %v490_v13, 7  ;;  %v499_v20 = vmul.f32 %v498_v16, %v465_v49  ;;  %v723_v49 = vld [vmem:[#allocation7 + $0x188] sm:$0xff] }
 0x2a5   : > { %v1477_v51 = vpack.c.bf16 %v723_v49, %v722_v48  ;;  %v650_v48 = vrot.slane %v2085_v12, %v649_v47 }
 0x2a6   : > { %v494_v18 = vsub.f32 %v2085_v12, %v492_v14 }
 0x2a8   : > { %v503_v21 = vrot.slane %v494_v18, %v502_v17 }
 0x2aa   : > { %v504_v22 = vadd.f32 %v503_v21, %v499_v20 }
 0x2ac   : > { %v505_v23 = vmax.f32 %v504_v22, 0.0 }
 0x2ae   : > { %1273 = vmatmul.mubr.f32.vlgmr.msra.gmra.mrb[2].mxu0 %v505_v23 }
 0x2af   : > { %1342 = vmatprep.mubr.msk.f32.mxu0 %vm1811_vm0, %v1812_v1  ;;  %1478 = vmatpush3.bf16.msra.mxu0 %v1477_v51 }
 0x2b0   : > { %1479 = vmatprep.subr.bf16.mxu0 %v1810_v0 }
 0x2b3   : > { %1481 = vmatpush3.bf16.msra.mxu0 %v1480_v53  ;;  %v847_v53 = vld [vmem:[#allocation7 + $0x208] sm:$0xff] }
 0x2b4   : > { %1482 = vmatprep.subr.bf16.mxu0 %v1810_v0  ;;  %v1501_v54 = vpack.c.bf16 %v847_v53, %v846_v52 }
 0x2b7   : > { %1484 = vmatpush3.bf16.msra.mxu0 %v1483_v56 }
 0x2b8   : > { %1485 = vmatprep.subr.bf16.mxu0 %v1810_v0 }
 0x2bb   : > { %1487 = vmatpush3.bf16.msra.mxu0 %v1486_v59  ;;  %v1507_v59 = vpack.c.bf16 %v851_v58, %v850_v57 }
 0x2bc   : > { %1488 = vmatprep.subr.bf16.mxu0 %v1810_v0 }
 0x2bf   : > { %1490 = vmatpush3.bf16.msra.mxu0 %v1489_v62  ;;  %v1510_v62 = vpack.c.bf16 %v853_v61, %v852_v60 }
 0x2c0   : > { %1491 = vmatprep.subr.bf16.mxu0 %v1810_v0 }
 0x2c3   : > { %1493 = vmatpush3.bf16.msra.mxu0 %v1492_v3  ;;  %v1513_v3 = vpack.c.bf16 %v855_v2, %v854_v63 }
 0x2c4   : > { %1494 = vmatprep.subr.bf16.mxu0 %v1810_v0 }
 0x2c7   : > { %1496 = vmatpush3.bf16.msra.mxu0 %v1495_v6  ;;  %v1516_v6 = vpack.c.bf16 %v857_v5, %v856_v4 }
 0x2c8   : > { %1497 = vmatprep.subr.bf16.mxu0 %v1810_v0 }
 0x2cb   : > { %1499 = vmatpush3.bf16.msra.mxu0 %v1498_v46 }
 0x381   : > { %v589_v7 = vpop.f32.mrb[2].mxu0 }
 0x382   : > { %v593_v8 = vrot.slane %v589_v7, 4  ;;  %v599_v9 = vmul.f32 %v589_v7, %v589_v7  ;;  %v1274_v10 = vpop.f32.mrb[3].mxu0 }
 0x383   : > { %v860_v10 = vld [vmem:[#allocation7 + $0x270] sm:$0xff] }
 0x384   : > { %v594_v13 = vadd.f32 %v593_v8, %v589_v7  ;;  %v600_v14 = vrot.slane %v599_v9, 4  ;;  %v859_v8 = vld [vmem:[#allocation7 + $0x268] sm:$0xff] }
 0x386   : > { %v595_v16 = vrot.slane %v594_v13, 2  ;;  %v601_v17 = vadd.f32 %v600_v14, %v599_v9 }
 0x388   : > { %v596_v18 = vadd.f32 %v595_v16, %v594_v13  ;;  %v602_v20 = vrot.slane %v601_v17, 2  ;;  %v861_v13 = vld [vmem:[#allocation7 + $0x278] sm:$0xff] }
 0x389   : > { %v1522_v14 = vpack.c.bf16 %v861_v13, %v860_v10 }
 0x38a   : > { %v597_v21 = vrot.slane %v596_v18, 1  ;;  %v603_v22 = vadd.f32 %v602_v20, %v601_v17 }
 0x38c   : > { %v598_v23 = vadd.f32 %v597_v21, %v596_v18  ;;  %v604_v24 = vrot.slane %v603_v22, 1 }
 0x38e   : > { %v605_v25 = vadd.f32 %v604_v24, %v603_v22  ;;  %v606_v26 = vmul.f32 0.125, %v598_v23 }
 0x390   : > { %v607_v27 = vmul.f32 0.125, %v605_v25  ;;  %v608_v28 = vmul.f32 %v606_v26, %v606_v26 }
 0x392   : > { %v609_v29 = vsub.f32 %v607_v27, %v608_v28 }
 0x394   : > { %v610_v30 = vmax.f32 %v609_v29, 0.0 }
 0x396   : > { %v611_v31 = vadd.f32 1e-05, %v610_v30 }
 0x398   : > { %1610 = vrsqrt.f32 %v611_v31 }
 0x3a2   : > { %v1611_v32 = vpop.eup %1610 }
 0x3a3   : > { %v613_v33 = vmul.f32 %v1611_v32, %v2085_v12 }
 0x3a5   : > { %v614_v35 = vmul.f32 %v613_v33, %v606_v26  ;;  %v622_v37 = vrot.slane %v613_v33, %v621_v34 }
 0x3a7   : > { %v616_v36 = vrot.slane %v614_v35, 7  ;;  %v623_v40 = vmul.f32 %v622_v37, %v589_v7  ;;  %v858_v7 = vld [vmem:[#allocation7 + $0x260] sm:$0xff] }
 0x3a8   : > { %v1519_v9 = vpack.c.bf16 %v859_v8, %v858_v7 }
 0x3a9   : > { %v618_v39 = vsub.f32 %v2085_v12, %v616_v36 }
 0x3ab   : > { %v627_v41 = vrot.slane %v618_v39, %v626_v38  ;;  %v836_v39 = vsub.s32 7, %v2083_v11 }
 0x3ad   : > { %v628_v42 = vadd.f32 %v627_v41, %v623_v40  ;;  %v258_v41 = vld [vmem:[#allocation8 + $0x8] sm:$0x3] }
 0x3af   : > { %v629_v43 = vmax.f32 %v628_v42, 0.0 }
 0x3b1   : > { %1308 = vmatmul.mubr.f32.vlgmr.msra.gmra.mrb[2].mxu1 %v629_v43 }
 0x3b2   : > { %1377 = vmatprep.mubr.msk.f32.mxu1 %vm1811_vm0, %v1812_v1  ;;  %1502 = vmatpush3.bf16.msra.mxu1 %v1501_v54  ;;  %v849_v1 = vld [vmem:[#allocation7 + $0x218] sm:$0xff] }
 0x3b3   : > { %1503 = vmatprep.subr.bf16.mxu1 %v1810_v0  ;;  %v1504_v56 = vpack.c.bf16 %v849_v1, %v848_v55 }
 0x3b6   : > { %1505 = vmatpush3.bf16.msra.mxu1 %v1504_v56 }
 0x3b7   : > { %1506 = vmatprep.subr.bf16.mxu1 %v1810_v0 }
 0x3ba   : > { %1508 = vmatpush3.bf16.msra.mxu1 %v1507_v59 }
 0x3bb   : > { %1509 = vmatprep.subr.bf16.mxu1 %v1810_v0 }
 0x3be   : > { %1511 = vmatpush3.bf16.msra.mxu1 %v1510_v62 }
 0x3bf   : > { %1512 = vmatprep.subr.bf16.mxu1 %v1810_v0 }
 0x3c2   : > { %1514 = vmatpush3.bf16.msra.mxu1 %v1513_v3 }
 0x3c3   : > { %1515 = vmatprep.subr.bf16.mxu1 %v1810_v0 }
 0x3c6   : > { %1517 = vmatpush3.bf16.msra.mxu1 %v1516_v6 }
 0x3c7   : > { %1518 = vmatprep.subr.bf16.mxu1 %v1810_v0 }
 0x3ca   : > { %1520 = vmatpush3.bf16.msra.mxu1 %v1519_v9 }
 0x3cb   : > { %1521 = vmatprep.subr.bf16.mxu1 %v1810_v0 }
 0x3ce   : > { %1523 = vmatpush3.bf16.msra.mxu1 %v1522_v14 }
 0x484   : > { %v717_v49 = vpop.f32.mrb[2].mxu1 }
 0x485   : > { %v718_v50 = vadd.f32 %v717_v49, %v650_v48  ;;  %v1309_v51 = vpop.f32.mrb[3].mxu1  ;;  %v865_v49 = vrot.slane %v258_v41, %v379_v19 }
 0x487   : > { %1343 = vmatmul.mubr.f32.vlgmr.msra.gmra.mrb[4].mxu0 %v718_v50 }
 0x55a   : > { %v804_v16 = vpop.f32.mrb[4].mxu0 }
 0x55b   : > { %v808_v17 = vrot.slane %v804_v16, 4  ;;  %v814_v18 = vmul.f32 %v804_v16, %v804_v16  ;;  %v1344_v20 = vpop.f32.mrb[5].mxu0 }
 0x55d   : > { %v809_v21 = vadd.f32 %v808_v17, %v804_v16  ;;  %v815_v22 = vrot.slane %v814_v18, 4 }
 0x55f   : > { %v810_v23 = vrot.slane %v809_v21, 2  ;;  %v816_v24 = vadd.f32 %v815_v22, %v814_v18 }
 0x561   : > { %v811_v25 = vadd.f32 %v810_v23, %v809_v21  ;;  %v817_v26 = vrot.slane %v816_v24, 2 }
 0x563   : > { %v812_v27 = vrot.slane %v811_v25, 1  ;;  %v818_v28 = vadd.f32 %v817_v26, %v816_v24 }
 0x565   : > { %v813_v29 = vadd.f32 %v812_v27, %v811_v25  ;;  %v819_v30 = vrot.slane %v818_v28, 1 }
 0x567   : > { %v820_v31 = vadd.f32 %v819_v30, %v818_v28  ;;  %v821_v0 = vmul.f32 0.125, %v813_v29 }
 0x569   : > { %v822_v32 = vmul.f32 0.125, %v820_v31  ;;  %v823_v33 = vmul.f32 %v821_v0, %v821_v0 }
 0x56b   : > { %v824_v34 = vsub.f32 %v822_v32, %v823_v33 }
 0x56d   : > { %v825_v35 = vmax.f32 %v824_v34, 0.0 }
 0x56f   : > { %v826_v36 = vadd.f32 1e-05, %v825_v35 }
 0x571   : > { %1612 = vrsqrt.f32 %v826_v36 }
 0x57b   : > { %v1613_v37 = vpop.eup %1612 }
 0x57c   : > { %v828_v38 = vmul.f32 %v1613_v37, %v2085_v12 }
 0x57e   : > { %v829_v40 = vmul.f32 %v828_v38, %v821_v0  ;;  %v837_v43 = vrot.slane %v828_v38, %v836_v39 }
 0x580   : > { %v831_v42 = vrot.slane %v829_v40, 7  ;;  %v838_v45 = vmul.f32 %v837_v43, %v804_v16 }
 0x582   : > { %v833_v44 = vsub.f32 %v258_v41, %v831_v42 }
 0x584   : > { %v842_v46 = vrot.slane %v833_v44, %v374_v15 }
 0x586   : > { %v843_v47 = vadd.f32 %v842_v46, %v838_v45 }
 0x588   : > { %v844_v48 = vmax.f32 %v843_v47, 0.0 }
 0x58a   : > { %1378 = vmatmul.mubr.f32.vlgmr.msra.gmra.mrb[4].mxu1 %v844_v48 }
 0x65d   : > { %v932_v12 = vpop.f32.mrb[4].mxu1 }
 0x65e   : > { %v933_v50 = vadd.f32 %v932_v12, %v865_v49  ;;  %v1379_v51 = vpop.f32.mrb[5].mxu1 }
 0x660   : > { %936 = vst [vmem:[%s256_s23] sm:$0xff] %v933_v50 }
 0x661   : > { %1741 = shalt.err (!%p1738_p4)
}
 0x662   : > { %s1742_s30 = scalar_lea.hbm %s2153_s8, 128  ;;  %s1746_s5 = scalar_lea.hbm %s2201_s4, 256 }
 0x663   : > { %p1743_p0 = scmp.ne.s32.totalorder %s2153_s8, %s1742_s30  ;;  %p1747_p8 = scmp.lt.u32.totalorder %s2153_s8, %s2201_s4 }
 0x664   : > { %p1748_p13 = scmp.lt.u32.totalorder %s1746_s5, %s1742_s30  ;;  %p1750_p10 = scmp.lt.u32.totalorder %s1742_s30, %s2153_s8 }
 0x665   : > { %p1744_p9 = pnand %p1743_p0, %p1993_p5 }
 0x666   : > { %p1749_p6 = por %p1748_p13, %p1747_p8 }
 0x667   : > { %p1745_p11 = pneg %p1744_p9 }
 0x668   : > { %p1751_p3 = por %p1750_p10, %p1749_p6 }
 0x66a   : > { %p1752_p7 = pnand %p1751_p3, %p1745_p11 }
 0x66c   : > { %1755 = shalt.err (!%p1752_p7)
}
 0x66d   : > { %1538 = dma.vmem_to_hbm [thread:$0]  (%p1993_p5), %s2155_s29, 128, %s2153_s8, %s938_s26  }
 0x66e PF: > { %s963_s11 = sand.u32 1, %s1790_s15   ;;  %p2219_p12 = scmp.ne.s32.totalorder %s2206_s22, 0 }
 0x66f   : > { %p2220_p1 = scmp.ge.s32.totalorder %s1802_s18, 2  ;;  %s964_s21 = scalar_lea.sflag [#allocation4], %s963_s11 }
 0x671   : > { %p1555_p2 = pnand %p2220_p1, %p2219_p12 }
 0x673   : > { %1785 = dma.done.wait (!%p1555_p2), %s964_s21, 128  }
 0x674   : > { %1787 = vsyncadd (!%p1555_p2), %s964_s21, 4294967168  ;;  %p19_p4 = scmp.ge.s32.totalorder %s1979_s10, 4   ;;  %s2221_s15 = smov %s1794_s16 }
 0x675   : > { %s2222_s16 = smov %s1798_s17  ;;  %s2223_s17 = smov %s1989_s12 }
 0x676   : > { %s2224_s18 = smov %s1979_s10  ;;  %21 = sbr.rel (!%p19_p4) target bundleno = 7 (0x7), region = 97 }
 0x67d   :  { %969 = vsyncpa [#allocation3], 1 }
 0x67e   :  { %971 = vsyncpa [#allocation3 + $0x1], 1 }
 0x67f   :  { %972 = vsyncpa [#allocation6], 1 }
 0x680   :  { %973 = vsyncpa [#allocation9], 1 }
 0x681   :  { %974 = vsyncpa [#allocation4], 1 }
 0x682   :  { %976 = vsyncpa [#allocation4 + $0x1], 1 }

</bundles_post_ra>
